<compile_context>
chip_gen: v7x
topology: tpu7x:2x2x1
jax: 0.10.0
libtpu: 0.0.40
codegen_flags: <defaults>
</compile_context>

<pallas_src>
import jax
import jax.numpy as jnp
from jax.experimental import pallas as pl
from jax.experimental.pallas import tpu as pltpu


_LANE = 128
# Native sublane packing multiple by itemsize (f32 -> 8, bf16 -> 16, int8 -> 32).
_SUBLANE_BY_ITEMSIZE = {4: 8, 2: 16, 1: 32}

# Below this the fused XLA elementwise op wins over a kernel launch.
_SMALL_INPUT_BYTES = 256 * 1024
# ~8 MiB per block: double-buffered in+out ~= 32 MiB resident (fits the 48 MiB
# scoped limit below; default pipeline depth kept so v7x's 64 MiB VMEM has
# headroom -- pl.Buffered(3) was considered but not needed for this op).
_TARGET_BLOCK_BYTES = 8 * 1024 * 1024
# Floor so very small grids don't degenerate into per-step overhead.
_MIN_BLOCK_BYTES = 128 * 1024
# Keep >= 4 grid steps when possible so the "parallel" grid splits across
# v7x's two TensorCores (and pipelines on every generation).
_MIN_GRID = 4
# Explicit scoped-VMEM limit: <= v7x's 64 MiB physical per TC, far below
# v5e/v6e's 128 MiB, and above v5e's 16 MiB default so big blocks still fit.
_VMEM_LIMIT_BYTES = 48 * 1024 * 1024


def _silu_kernel(x_ref, o_ref):
    # sigmoid(x) = 0.5*tanh(0.5*x) + 0.5  -> one EUP transcendental, no exact
    # divide (VALU stays clear).  f32 math for v5e compatibility + accuracy;
    # the op is HBM-bound so the compute is hidden under DMA.
    xf = x_ref[...].astype(jnp.float32)
    sig = 0.5 * jnp.tanh(0.5 * xf) + 0.5
    o_ref[...] = (xf * sig).astype(o_ref.dtype)


def _round_up(x, m):
    return ((x + m - 1) // m) * m


def _sublane(dtype):
    return _SUBLANE_BY_ITEMSIZE.get(jnp.dtype(dtype).itemsize, 8)


def _pick_block_units(total_units, gran, bytes_per_unit):
    """Block length (in `gran`-aligned units) for a 1-D grid over `total_units`."""
    target = _round_up(max(1, _TARGET_BLOCK_BYTES // bytes_per_unit), gran)
    split = _round_up(pl.cdiv(total_units, _MIN_GRID), gran)
    floor_ = _round_up(max(1, _MIN_BLOCK_BYTES // bytes_per_unit), gran)
    blk = max(min(target, split), floor_)
    return min(blk, _round_up(total_units, gran))


def _compiler_params():
    return pltpu.CompilerParams(
        dimension_semantics=("parallel",),
        vmem_limit_bytes=_VMEM_LIMIT_BYTES,
    )


def _cost(n, itemsize):
    return pl.CostEstimate(
        flops=4 * n,            # tanh-form sigmoid + multiply (approx.)
        transcendentals=n,      # one tanh per element
        bytes_accessed=2 * n * itemsize,
    )


def _silu_pallas_2d(x2d):
    """Lane-dense [rows, 128] path (element count divisible by 128)."""
    rows, _ = x2d.shape
    dtype = x2d.dtype
    itemsize = jnp.dtype(dtype).itemsize
    tr = _pick_block_units(rows, _sublane(dtype), _LANE * itemsize)
    return pl.pallas_call(
        _silu_kernel,
        out_shape=jax.ShapeDtypeStruct((rows, _LANE), dtype),
        grid_spec=pltpu.PrefetchScalarGridSpec(
            num_scalar_prefetch=0,
            grid=(pl.cdiv(rows, tr),),
            in_specs=[pl.BlockSpec((tr, _LANE), lambda i: (i, 0))],
            out_specs=pl.BlockSpec((tr, _LANE), lambda i: (i, 0)),
        ),
        compiler_params=_compiler_params(),
        cost_estimate=_cost(rows * _LANE, itemsize),
    )(x2d)


def _silu_pallas_1d(x_flat):
    """Flat 1-D path: Pallas masks the partial last block -> no pad/slice."""
    (n,) = x_flat.shape
    dtype = x_flat.dtype
    itemsize = jnp.dtype(dtype).itemsize
    be = _pick_block_units(n, _sublane(dtype) * _LANE, itemsize)
    return pl.pallas_call(
        _silu_kernel,
        out_shape=jax.ShapeDtypeStruct((n,), dtype),
        grid_spec=pltpu.PrefetchScalarGridSpec(
            num_scalar_prefetch=0,
            grid=(pl.cdiv(n, be),),
            in_specs=[pl.BlockSpec((be,), lambda i: (i,))],
            out_specs=pl.BlockSpec((be,), lambda i: (i,)),
        ),
        compiler_params=_compiler_params(),
        cost_estimate=_cost(n, itemsize),
    )(x_flat)


# One-time per-dtype capability probe for the ragged 1-D masked-block path.
# If this Mosaic build can't lower 1-D blocks (older releases), we degrade to
# the single-pass fused XLA op instead of failing or padding the whole array.
_RAGGED_1D_SUPPORTED = {}


def _ragged_1d_supported(dtype):
    key = jnp.dtype(dtype).name
    ok = _RAGGED_1D_SUPPORTED.get(key)
    if ok is None:
        try:
            n_probe = 40_000  # multi-block grid + masked partial last block
            t = jnp.linspace(-4.0, 4.0, n_probe).astype(dtype)
            got = jax.block_until_ready(_silu_pallas_1d(t))
            tf = t.astype(jnp.float32)
            ref = (tf * jax.nn.sigmoid(tf)).astype(dtype)
            ok = bool(
                jnp.allclose(
                    got.astype(jnp.float32), ref.astype(jnp.float32),
                    atol=1e-2, rtol=1e-2,
                )
            )
        except Exception:
            ok = False
        _RAGGED_1D_SUPPORTED[key] = ok
    return ok


def glu(x):
    """Forward of the CycleGAN-VC2 `GLU` module: x * sigmoid(x) (SiLU/Swish)."""
    orig_shape = x.shape
    dtype = x.dtype
    n = x.size
    if n == 0:
        return x
    itemsize = jnp.dtype(dtype).itemsize

    def _xla_fallback(v):
        # Single fused XLA elementwise pass (already HBM-roofline for this op).
        return v * jax.nn.sigmoid(v)

    # Tiny activations (the shapes this model actually produces): kernel launch
    # + wrapper reshapes are pure overhead.
    if n * itemsize < _SMALL_INPUT_BYTES:
        return _xla_fallback(x)

    if n % _LANE == 0:
        # Contiguous row-major reshape is a bitcast -> no extra HBM traffic.
        rows = n // _LANE
        return _silu_pallas_2d(x.reshape(rows, _LANE)).reshape(orig_shape)

    # Ragged element count: no jnp.pad / output slice (each would be a full
    # extra HBM read+write pass).  Feed the flat view, mask the partial block.
    if _ragged_1d_supported(dtype):
        return _silu_pallas_1d(x.reshape(-1)).reshape(orig_shape)
    return _xla_fallback(x)


if __name__ == "__main__":
    key = jax.random.PRNGKey(0)
    k0, k1, k2 = jax.random.split(key, 3)

    def _ref(v):
        return v * jax.nn.sigmoid(v)

    def _check(v, atol=1e-5, rtol=1e-5):
        out = jax.block_until_ready(glu(v))
        assert out.shape == v.shape and out.dtype == v.dtype
        assert jnp.allclose(out, _ref(v), atol=atol, rtol=rtol), "mismatch"
        return out

    # 1) The tiny NCHW activation the CycleGAN-VC2 discriminator actually
    #    produces: served by the fused-XLA small-input fallback.
    x_small = jax.random.normal(k0, (2, 4, 16, 16), dtype=jnp.float32)
    _check(x_small)

    # 2) Modest activation with element count % 128 == 0: exercises the
    #    lane-dense 2-D Pallas kernel with a multi-block parallel grid.
    x_div = jax.random.normal(k1, (2, 16, 64, 64), dtype=jnp.float32)
    _check(x_div)

    # 3) Modest activation with a ragged element count (n % 128 != 0):
    #    exercises the pad/slice-free 1-D masked-block path (or its fused-XLA
    #    safety net if 1-D blocks are unsupported on this build).
    x_rag = jax.random.normal(k2, (5, 13, 41, 29), dtype=jnp.float32)
    _check(x_rag)

    print("KERNEL_OK")
</pallas_src>

<mosaic_0001>
module attributes {stable_mosaic.version = 11 : i64} {
  func.func @_silu_kernel(%arg0: i32, %arg1: memref<256x128xf32, #tpu.memory_space<vmem>>, %arg2: memref<256x128xf32, #tpu.memory_space<vmem>>) attributes {dimension_semantics = [#tpu.dimension_semantics<parallel>], iteration_bounds = array<i64: 4>, scalar_prefetch = 0 : i64, scratch_operands = 0 : i64, tpu.core_type = #tpu.core_type<tc>, window_params = [{transform_indices = @transform_0, window_bounds = array<i64: 256, 128>}, {transform_indices = @transform_1, window_bounds = array<i64: 256, 128>}]} {
    %c0 = arith.constant 0 : index
    %c0_0 = arith.constant 0 : index
    %0 = vector.load %arg1[%c0, %c0_0] : memref<256x128xf32, #tpu.memory_space<vmem>>, vector<256x128xf32>
    %cst = arith.constant 5.000000e-01 : f32
    %1 = vector.broadcast %cst : f32 to vector<256x128xf32>
    %2 = arith.mulf %1, %0 : vector<256x128xf32>
    %3 = math.tanh %2 : vector<256x128xf32>
    %cst_1 = arith.constant 5.000000e-01 : f32
    %4 = vector.broadcast %cst_1 : f32 to vector<256x128xf32>
    %5 = arith.mulf %4, %3 : vector<256x128xf32>
    %cst_2 = arith.constant 5.000000e-01 : f32
    %6 = vector.broadcast %cst_2 : f32 to vector<256x128xf32>
    %7 = arith.addf %5, %6 : vector<256x128xf32>
    %8 = arith.mulf %0, %7 : vector<256x128xf32>
    %c0_3 = arith.constant 0 : index
    %c0_4 = arith.constant 0 : index
    %9 = vector.load %arg2[%c0_3, %c0_4] : memref<256x128xf32, #tpu.memory_space<vmem>>, vector<256x128xf32>
    tpu.vector_store %arg2[%c0_3, %c0_4], %8 {strides = array<i32>} : memref<256x128xf32, #tpu.memory_space<vmem>>, vector<256x128xf32>,
    return
  }
  func.func @transform_0(%arg0: i32) -> (i32, i32) {
    %c0_i32 = arith.constant 0 : i32
    %c0_i32_0 = arith.constant 0 : i32
    return %arg0, %c0_i32 : i32, i32
  }
  func.func @transform_1(%arg0: i32) -> (i32, i32) {
    %c0_i32 = arith.constant 0 : i32
    %c0_i32_0 = arith.constant 0 : i32
    return %arg0, %c0_i32 : i32, i32
  }
}

</mosaic_0001>

<bundles_post_ra>
// kernel: tpu_custom_call.1
= control target key start
LH: loop header
LB: loop body
LE: loop exit
PB: predicated region body
PF: predicated region fallthrough
CT: control target
= control target key end

     0   :  { %6 = vsyncpa [#allocation3], 0  ;;  %s1092_s0 = inlined_call_operand.hbm [shape: f32[1024,128], index: 0, kind: input, shape index: {}]   ;;  %s1093_s1 = inlined_call_operand.hbm [shape: f32[1024,128], index: 1, kind: output, shape index: {}]  }
   0x1   :  { %8 = vsyncpa [#allocation3 + $0x1], 0 }
   0x2   :  { %9 = vsyncpa [#allocation4], 0 }
   0x3   :  { %11 = vsyncpa [#allocation4 + $0x1], 0  ;;  %s692_s6 = smov 0   ;;  %s694_s7 = smov 0  }
   0x4   :  { %s696_s8 = smov 0   ;;  %s698_s9 = smov 0  }
   0x5 LB: > { %s713_s10 = sadd.s32 4294967295, %s674_s9   ;;  %s448_s11 = sadd.s32 4294967294, %s674_s9   ;;  %s674_s9 = sphi %s698_s9, %s1111_s9   ;;  %s670_s8 = sphi %s696_s8, %s1110_s8   ;;  %s666_s7 = sphi %s694_s7, %s1109_s7   ;;  %s662_s6 = sphi %s692_s6, %s1108_s6  }
   0x6   : > { %s717_s12 = sadd.s32 1, %s674_s9   ;;  %s24_s13 = sadd.s32 1, %s670_s8 }
   0x7   : > { %s21_s14 = ssub.s32 %s674_s9, %s717_s12  ;;  %p31_p0 = scmp.ne.s32.totalorder %s670_s8, %s666_s7 }
   0x8   : > { %p22_p1 = scmp.eq.s32.totalorder %s21_s14, 0  ;;  %p32_p2 = scmp.eq.s32.totalorder %s674_s9, 0 }
   0x9   : > { %p37_p3 = scmp.ne.s32.totalorder %s666_s7, %s662_s6  ;;  %p38_p4 = scmp.eq.s32.totalorder %s713_s10, 0 }
   0xa   : > { %s729_s15 = scalar_select %p22_p1, %s670_s8, %s24_s13  }
   0xb   : > { %p731_p5 = por %p32_p2, %p31_p0  ;;  %p735_p6 = por %p38_p4, %p37_p3 }
   0xc   : > { %p61_p7 = scmp.eq.s32.totalorder %s713_s10, 3  ;;  %p67_p8 = scmp.eq.s32.totalorder %s448_s11, 3 }
   0xd   : > { %p476_p9 = scmp.lt.s32.totalorder %s674_s9, 4  ;;  %s87_s20 = sand.u32 1, %s670_s8  }
   0xe   : > { %p741_p10 = por %p61_p7, %p31_p0  ;;  %p745_p11 = por %p67_p8, %p37_p3 }
   0xf   : > { %s462_s21 = sshll.u32 %s674_s9, 12  ;;  %s451_s22 = sshll.u32 %s87_s20, 8 }
  0x10   : > { %s1099_s18 = scalar_select %p741_p10, 1, 0 }
  0x11   : > { %s1100_s19 = scalar_select %p745_p11, 1, 0 }
  0x12   : > { %s754_s25 = scalar_lea.hbm %s1092_s0, %s462_s21  ;;  %s91_s26 = scalar_lea.vmem [#allocation2], %s451_s22 }
  0x13   : > { %s98_s27 = sshll.u32 %s91_s26, 4  ;;  %p758_p12 = pnand %p476_p9, %p731_p5  ;;  %s762_s27 = int_to_ptr.vmem [resolvable:$true] %s98_s27 }
  0x14   : > { %s764_s29 = scalar_lea.sflag [#allocation3], %s87_s20  ;;  %s578_s30 = scalar_lea.hbm %s754_s25, 4096 }
  0x15   : > { %p579_p13 = scmp.ne.s32.totalorder %s754_s25, %s578_s30  ;;  %p580_p0 = pneg %p758_p12 }
  0x16   : > { %s583_s4 = scalar_lea.hbm %s1092_s0, 16384  ;;  %p584_p3 = scmp.lt.u32.totalorder %s754_s25, %s1092_s0 }
  0x17   : > { %p581_p1 = pnand %p580_p0, %p579_p13  ;;  %p585_p4 = scmp.lt.u32.totalorder %s583_s4, %s578_s30 }
  0x18   : > { %p587_p7 = scmp.lt.u32.totalorder %s578_s30, %s754_s25 }
  0x19   : > { %p582_p2 = pneg %p581_p1  ;;  %p586_p5 = por %p585_p4, %p584_p3 }
  0x1b   : > { %p588_p8 = por %p587_p7, %p586_p5 }
  0x1d   : > { %p589_p9 = pnand %p588_p8, %p582_p2 }
  0x1f   : > { %592 = shalt.err (!%p589_p9)
}
  0x20   : > { %s593_s13 = scalar_lea.vmem %s762_s27, 4096  ;;  %s676_s14 = smov [#allocation2]  }
  0x21   : > { %p594_p13 = scmp.ne.s32.totalorder %s762_s27, %s593_s13  ;;  %s598_s16 = sshll.u32 %s676_s14, 4  ;;  %s599_s16 = int_to_ptr.vmem [resolvable:$false] %s598_s16 }
  0x22   : > { %s600_s20 = scalar_lea.vmem %s599_s16, 8192  ;;  %p601_p10 = scmp.lt.s32.totalorder %s762_s27, %s599_s16 }
  0x23   : > { %p596_p1 = pnand %p594_p13, %p580_p0  ;;  %p602_p3 = scmp.lt.s32.totalorder %s600_s20, %s593_s13 }
  0x25   : > { %p597_p11 = pneg %p596_p1  ;;  %p603_p4 = por %p602_p3, %p601_p10 }
  0x27   : > { %p604_p5 = pnand %p603_p4, %p597_p11 }
  0x29   : > { %607 = shalt.err (!%p604_p5)
}
  0x2a   : > { %s677_s21 = smov 128   ;;  %s678_s22 = smov 8  }
  0x2b   : > { %471 = dma.hbm_to_vmem [thread:$0]  (!%p758_p12), %s754_s25, 4096, %s762_s27, %s764_s29, %s677_s21, %s677_s21, %s678_s22  }
  0x2c   : > { %p454_p0 = scmp.ge.s32.totalorder %s674_s9, 1  ;;  %p106_p2 = scmp.lt.s32.totalorder %s674_s9, 5 }
  0x2e   : > { %p107_p7 = pnand %p454_p0, %p106_p2 }
  0x30   : > { %110 = sbr.rel (%p107_p7) target bundleno = 125 (0x7d), region = 24 }
  0x37   : > { %s795_s23 = sand.u32 1, %s666_s7  }
  0x38   : > { %s455_s24 = sshll.u32 %s795_s23, 8  ;;  %s113_s26 = scalar_lea.sflag [#allocation3], %s795_s23 }
  0x39   : > { %s801_s30 = scalar_lea.vmem [#allocation2], %s455_s24 }
  0x3a   : > { %653 = dma.done.wait (%p735_p6), %s113_s26, 4096  }
  0x3b   : > { %655 = vsyncadd (%p735_p6), %s113_s26, 4294963200  ;;  %v808_v0 = vld [vmem:[%s801_s30] sm:$0xff]  ;;  %v811_v1 = vld [vmem:[%s801_s30 + $0x8] sm:$0xff]  ;;  %s965_s17 = scalar_lea.vmem [#allocation5], %s455_s24  ;;  %s463_s25 = sshll.u32 %s713_s10, 12 }
  0x3c   : > { %v814_v2 = vld [vmem:[%s801_s30 + $0x10] sm:$0xff]  ;;  %v169_v3 = vmul.f32 0.5, %v808_v0  ;;  %v170_v4 = vmul.f32 0.5, %v811_v1  ;;  %v820_v6 = vld [vmem:[%s801_s30 + $0x18] sm:$0xff]  ;;  %v823_v7 = vld [vmem:[%s801_s30 + $0x20] sm:$0xff]  ;;  %s375_s27 = sshll.u32 %s965_s17, 4  ;;  %s1043_s2 = scalar_lea.hbm %s1093_s1, %s463_s25  ;;  %s1045_s27 = int_to_ptr.vmem [resolvable:$true] %s375_s27 }
  0x3d   : > { %v171_v5 = vmul.f32 0.5, %v814_v2  ;;  %v826_v8 = vld [vmem:[%s801_s30 + $0x28] sm:$0xff]  ;;  %v172_v9 = vmul.f32 0.5, %v820_v6  ;;  %v830_v10 = vld [vmem:[%s801_s30 + $0x30] sm:$0xff]  ;;  %v173_v11 = vmul.f32 0.5, %v823_v7  ;;  %v834_v12 = vld [vmem:[%s801_s30 + $0x38] sm:$0xff] }
  0x3e   : > { %514 = vtanh.f32 %v169_v3  ;;  %v174_v13 = vmul.f32 0.5, %v826_v8  ;;  %v838_v14 = vld [vmem:[%s801_s30 + $0x40] sm:$0xff]  ;;  %v175_v15 = vmul.f32 0.5, %v830_v10  ;;  %v842_v16 = vld [vmem:[%s801_s30 + $0x48] sm:$0xff]  ;;  %v845_v17 = vld [vmem:[%s801_s30 + $0x50] sm:$0xff]  ;;  %v176_v18 = vmul.f32 0.5, %v834_v12 }
  0x3f   : > { %516 = vtanh.f32 %v170_v4  ;;  %v849_v19 = vld [vmem:[%s801_s30 + $0x58] sm:$0xff]  ;;  %v852_v20 = vld [vmem:[%s801_s30 + $0x60] sm:$0xff]  ;;  %v855_v21 = vld [vmem:[%s801_s30 + $0x68] sm:$0xff]  ;;  %v177_v22 = vmul.f32 0.5, %v838_v14  ;;  %v178_v26 = vmul.f32 0.5, %v842_v16  ;;  %v179_v27 = vmul.f32 0.5, %v845_v17 }
  0x40   : > { %518 = vtanh.f32 %v171_v5  ;;  %v859_v23 = vld [vmem:[%s801_s30 + $0x70] sm:$0xff]  ;;  %v862_v24 = vld [vmem:[%s801_s30 + $0x78] sm:$0xff]  ;;  %v865_v25 = vld [vmem:[%s801_s30 + $0x80] sm:$0xff]  ;;  %v180_v31 = vmul.f32 0.5, %v849_v19  ;;  %v181_v32 = vmul.f32 0.5, %v852_v20  ;;  %v182_v33 = vmul.f32 0.5, %v855_v21 }
  0x41   : > { %520 = vtanh.f32 %v172_v9  ;;  %v870_v28 = vld [vmem:[%s801_s30 + $0x88] sm:$0xff]  ;;  %v873_v29 = vld [vmem:[%s801_s30 + $0x90] sm:$0xff]  ;;  %v876_v30 = vld [vmem:[%s801_s30 + $0x98] sm:$0xff]  ;;  %v183_v37 = vmul.f32 0.5, %v859_v23  ;;  %v184_v38 = vmul.f32 0.5, %v862_v24  ;;  %v185_v39 = vmul.f32 0.5, %v865_v25 }
  0x42   : > { %522 = vtanh.f32 %v173_v11  ;;  %v882_v34 = vld [vmem:[%s801_s30 + $0xa0] sm:$0xff]  ;;  %v885_v35 = vld [vmem:[%s801_s30 + $0xa8] sm:$0xff]  ;;  %v888_v36 = vld [vmem:[%s801_s30 + $0xb0] sm:$0xff]  ;;  %v186_v43 = vmul.f32 0.5, %v870_v28  ;;  %v187_v44 = vmul.f32 0.5, %v873_v29  ;;  %v905_v45 = vmul.f32 0.5, %v876_v30 }
  0x43   : > { %524 = vtanh.f32 %v174_v13  ;;  %v894_v40 = vld [vmem:[%s801_s30 + $0xb8] sm:$0xff]  ;;  %v897_v41 = vld [vmem:[%s801_s30 + $0xc0] sm:$0xff]  ;;  %v900_v42 = vld [vmem:[%s801_s30 + $0xc8] sm:$0xff]  ;;  %v914_v48 = vmul.f32 0.5, %v882_v34  ;;  %v917_v49 = vmul.f32 0.5, %v885_v35  ;;  %v920_v50 = vmul.f32 0.5, %v888_v36 }
  0x44   : > { %526 = vtanh.f32 %v175_v15  ;;  %v908_v46 = vld [vmem:[%s801_s30 + $0xd0] sm:$0xff]  ;;  %v911_v47 = vld [vmem:[%s801_s30 + $0xd8] sm:$0xff]  ;;  %v923_v51 = vld [vmem:[%s801_s30 + $0xe0] sm:$0xff]  ;;  %v929_v54 = vmul.f32 0.5, %v894_v40  ;;  %v932_v55 = vmul.f32 0.5, %v897_v41  ;;  %v935_v56 = vmul.f32 0.5, %v900_v42 }
  0x45   : > { %528 = vtanh.f32 %v176_v18  ;;  %v926_v52 = vld [vmem:[%s801_s30 + $0xe8] sm:$0xff]  ;;  %v938_v57 = vld [vmem:[%s801_s30 + $0xf0] sm:$0xff]  ;;  %v941_v60 = vmul.f32 0.5, %v908_v46  ;;  %v944_v61 = vmul.f32 0.5, %v911_v47  ;;  %v947_v62 = vld [vmem:[%s801_s30 + $0xf8] sm:$0xff]  ;;  %v950_v4 = vmul.f32 0.5, %v923_v51 }
  0x46   : > { %530 = vtanh.f32 %v177_v22  ;;  %1102 = vst [vmem:[#allocation8_spill] sm:$0xff] %v926_v52  ;;  %1103 = vst [vmem:[#allocation9_spill] sm:$0xff] %v938_v57  ;;  %v953_v5 = vmul.f32 0.5, %v926_v52  ;;  %v956_v15 = vmul.f32 0.5, %v938_v57  ;;  %s362_s10 = scalar_lea.sflag [#allocation4], %s795_s23  ;;  %s608_s3 = scalar_lea.vmem %s1045_s27, 4096 }
  0x47   : > { %532 = vtanh.f32 %v178_v26  ;;  %p609_p6 = scmp.ne.s32.totalorder %s1045_s27, %s608_s3  ;;  %p1106_p10 = scmp.ne.s32.totalorder %s1099_s18, 0 }
  0x48   : > { %v515_v53 = vpop.eup %514  ;;  %534 = vtanh.f32 %v179_v27  ;;  %v959_v27 = vmul.f32 0.5, %v947_v62  ;;  %s679_s4 = smov [#allocation5]  }
  0x49   : > { %v517_v58 = vpop.eup %516  ;;  %v233_v59 = vmul.f32 0.5, %v515_v53  ;;  %536 = vtanh.f32 %v180_v31  ;;  %p610_p11 = pnand %p609_p6, %p1106_p10  ;;  %s612_s5 = sshll.u32 %s679_s4, 4  ;;  %s613_s5 = int_to_ptr.vmem [resolvable:$false] %s612_s5 }
  0x4a   : > { %v519_v63 = vpop.eup %518  ;;  %v234_v3 = vmul.f32 0.5, %v517_v58  ;;  %538 = vtanh.f32 %v181_v32  ;;  %s614_s11 = scalar_lea.vmem %s613_s5, 8192  ;;  %p615_p8 = scmp.lt.s32.totalorder %s1045_s27, %s613_s5 }
  0x4b   : > { %v521_v9 = vpop.eup %520  ;;  %v265_v11 = vadd.f32 0.5, %v233_v59  ;;  %v235_v13 = vmul.f32 0.5, %v519_v63  ;;  %540 = vtanh.f32 %v182_v33  ;;  %p611_p12 = pneg %p610_p11  ;;  %p616_p9 = scmp.lt.s32.totalorder %s614_s11, %s608_s3 }
  0x4c   : > { %v523_v18 = vpop.eup %522  ;;  %v266_v22 = vadd.f32 0.5, %v234_v3  ;;  %v236_v26 = vmul.f32 0.5, %v521_v9  ;;  %542 = vtanh.f32 %v183_v37 }
  0x4d   : > { %v525_v31 = vpop.eup %524  ;;  %v297_v32 = vmul.f32 %v265_v11, %v808_v0  ;;  %v267_v53 = vadd.f32 0.5, %v235_v13  ;;  %v237_v58 = vmul.f32 0.5, %v523_v18  ;;  %544 = vtanh.f32 %v184_v38  ;;  %p617_p13 = por %p616_p9, %p615_p8 }
  0x4e   : > { %v527_v59 = vpop.eup %526  ;;  %v298_v33 = vmul.f32 %v266_v22, %v811_v1  ;;  %v268_v63 = vadd.f32 0.5, %v236_v26  ;;  %v238_v57 = vmul.f32 0.5, %v525_v31  ;;  %546 = vtanh.f32 %v185_v39 }
  0x4f   : > { %v529_v52 = vpop.eup %528  ;;  %329 = vst [vmem:[%s965_s17] sm:$0xff] %v297_v32  ;;  %v299_v37 = vmul.f32 %v267_v53, %v814_v2  ;;  %v269_v0 = vadd.f32 0.5, %v237_v58  ;;  %v239_v3 = vmul.f32 0.5, %v527_v59  ;;  %548 = vtanh.f32 %v186_v43  ;;  %p618_p1 = pnand %p617_p13, %p611_p12 }
  0x50   : > { %v531_v38 = vpop.eup %530  ;;  %330 = vst [vmem:[%s965_s17 + $0x8] sm:$0xff] %v298_v33  ;;  %v300_v1 = vmul.f32 %v268_v63, %v820_v6  ;;  %v270_v9 = vadd.f32 0.5, %v238_v57  ;;  %v240_v39 = vmul.f32 0.5, %v529_v52  ;;  %550 = vtanh.f32 %v187_v44 }
  0x51   : > { %v533_v11 = vpop.eup %532  ;;  %331 = vst [vmem:[%s965_s17 + $0x10] sm:$0xff] %v299_v37  ;;  %v301_v13 = vmul.f32 %v269_v0, %v823_v7  ;;  %v271_v18 = vadd.f32 0.5, %v239_v3  ;;  %v241_v22 = vmul.f32 0.5, %v531_v38  ;;  %552 = vtanh.f32 %v905_v45 }
  0x52   : > { %v535_v2 = vpop.eup %534  ;;  %332 = vst [vmem:[%s965_s17 + $0x18] sm:$0xff] %v300_v1  ;;  %v302_v43 = vmul.f32 %v270_v9, %v826_v8  ;;  %v272_v26 = vadd.f32 0.5, %v240_v39  ;;  %v242_v6 = vmul.f32 0.5, %v533_v11  ;;  %554 = vtanh.f32 %v914_v48 }
  0x53   : > { %v537_v52 = vpop.eup %536  ;;  %333 = vst [vmem:[%s965_s17 + $0x20] sm:$0xff] %v301_v13  ;;  %v303_v44 = vmul.f32 %v271_v18, %v830_v10  ;;  %v273_v57 = vadd.f32 0.5, %v241_v22  ;;  %v243_v7 = vmul.f32 0.5, %v535_v2  ;;  %556 = vtanh.f32 %v917_v49 }
  0x54   : > { %v539_v31 = vpop.eup %538  ;;  %334 = vst [vmem:[%s965_s17 + $0x28] sm:$0xff] %v302_v43  ;;  %v304_v45 = vmul.f32 %v272_v26, %v834_v12  ;;  %v274_v32 = vadd.f32 0.5, %v242_v6  ;;  %v244_v8 = vmul.f32 0.5, %v537_v52  ;;  %558 = vtanh.f32 %v920_v50 }
  0x55   : > { %v541_v53 = vpop.eup %540  ;;  %335 = vst [vmem:[%s965_s17 + $0x30] sm:$0xff] %v303_v44  ;;  %v305_v48 = vmul.f32 %v273_v57, %v838_v14  ;;  %v275_v58 = vadd.f32 0.5, %v243_v7  ;;  %v245_v10 = vmul.f32 0.5, %v539_v31  ;;  %560 = vtanh.f32 %v929_v54 }
  0x56   : > { %v543_v59 = vpop.eup %542  ;;  %336 = vst [vmem:[%s965_s17 + $0x38] sm:$0xff] %v304_v45  ;;  %v306_v49 = vmul.f32 %v274_v32, %v842_v16  ;;  %v276_v33 = vadd.f32 0.5, %v244_v8  ;;  %v246_v12 = vmul.f32 0.5, %v541_v53  ;;  %562 = vtanh.f32 %v932_v55 }
  0x57   : > { %v545_v63 = vpop.eup %544  ;;  %337 = vst [vmem:[%s965_s17 + $0x40] sm:$0xff] %v305_v48  ;;  %v307_v50 = vmul.f32 %v275_v58, %v845_v17  ;;  %v277_v37 = vadd.f32 0.5, %v245_v10  ;;  %v247_v14 = vmul.f32 0.5, %v543_v59  ;;  %564 = vtanh.f32 %v935_v56 }
  0x58   : > { %v547_v0 = vpop.eup %546  ;;  %338 = vst [vmem:[%s965_s17 + $0x48] sm:$0xff] %v306_v49  ;;  %v308_v54 = vmul.f32 %v276_v33, %v849_v19  ;;  %v278_v3 = vadd.f32 0.5, %v246_v12  ;;  %v248_v16 = vmul.f32 0.5, %v545_v63  ;;  %566 = vtanh.f32 %v941_v60 }
  0x59   : > { %v549_v38 = vpop.eup %548  ;;  %339 = vst [vmem:[%s965_s17 + $0x50] sm:$0xff] %v307_v50  ;;  %v309_v55 = vmul.f32 %v277_v37, %v852_v20  ;;  %v279_v1 = vadd.f32 0.5, %v247_v14  ;;  %v249_v17 = vmul.f32 0.5, %v547_v0  ;;  %568 = vtanh.f32 %v944_v61 }
  0x5a   : > { %v551_v9 = vpop.eup %550  ;;  %340 = vst [vmem:[%s965_s17 + $0x58] sm:$0xff] %v308_v54  ;;  %v310_v56 = vmul.f32 %v278_v3, %v855_v21  ;;  %v280_v39 = vadd.f32 0.5, %v248_v16  ;;  %v250_v19 = vmul.f32 0.5, %v549_v38  ;;  %570 = vtanh.f32 %v950_v4 }
  0x5b   : > { %v553_v11 = vpop.eup %552  ;;  %341 = vst [vmem:[%s965_s17 + $0x60] sm:$0xff] %v309_v55  ;;  %v311_v60 = vmul.f32 %v279_v1, %v859_v23  ;;  %v281_v13 = vadd.f32 0.5, %v249_v17  ;;  %v251_v20 = vmul.f32 0.5, %v551_v9  ;;  %572 = vtanh.f32 %v953_v5 }
  0x5c   : > { %v555_v18 = vpop.eup %554  ;;  %342 = vst [vmem:[%s965_s17 + $0x68] sm:$0xff] %v310_v56  ;;  %v312_v61 = vmul.f32 %v280_v39, %v862_v24  ;;  %v282_v21 = vadd.f32 0.5, %v250_v19  ;;  %v252_v22 = vmul.f32 0.5, %v553_v11  ;;  %574 = vtanh.f32 %v956_v15  ;;  %v1105_v19 = vld [vmem:[#allocation9_spill] sm:$0xff] }
  0x5d   : > { %v557_v2 = vpop.eup %556  ;;  %343 = vst [vmem:[%s965_s17 + $0x70] sm:$0xff] %v311_v60  ;;  %v313_v4 = vmul.f32 %v281_v13, %v865_v25  ;;  %v283_v23 = vadd.f32 0.5, %v251_v20  ;;  %v253_v43 = vmul.f32 0.5, %v555_v18  ;;  %576 = vtanh.f32 %v959_v27 }
  0x5e   : > { %v559_v26 = vpop.eup %558  ;;  %344 = vst [vmem:[%s965_s17 + $0x78] sm:$0xff] %v312_v61  ;;  %v314_v5 = vmul.f32 %v282_v21, %v870_v28  ;;  %v284_v24 = vadd.f32 0.5, %v252_v22  ;;  %v254_v6 = vmul.f32 0.5, %v557_v2 }
  0x5f   : > { %v561_v52 = vpop.eup %560  ;;  %345 = vst [vmem:[%s965_s17 + $0x80] sm:$0xff] %v313_v4  ;;  %v315_v15 = vmul.f32 %v283_v23, %v873_v29  ;;  %v285_v44 = vadd.f32 0.5, %v253_v43  ;;  %v255_v57 = vmul.f32 0.5, %v559_v26 }
  0x60   : > { %v563_v7 = vpop.eup %562  ;;  %346 = vst [vmem:[%s965_s17 + $0x88] sm:$0xff] %v314_v5  ;;  %v316_v25 = vmul.f32 %v284_v24, %v876_v30  ;;  %v286_v27 = vadd.f32 0.5, %v254_v6  ;;  %v256_v31 = vmul.f32 0.5, %v561_v52 }
  0x61   : > { %v565_v45 = vpop.eup %564  ;;  %347 = vst [vmem:[%s965_s17 + $0x90] sm:$0xff] %v315_v15  ;;  %v317_v28 = vmul.f32 %v285_v44, %v882_v34  ;;  %v287_v32 = vadd.f32 0.5, %v255_v57  ;;  %v257_v8 = vmul.f32 0.5, %v563_v7 }
  0x62   : > { %v567_v53 = vpop.eup %566  ;;  %348 = vst [vmem:[%s965_s17 + $0x98] sm:$0xff] %v316_v25  ;;  %v318_v29 = vmul.f32 %v286_v27, %v885_v35  ;;  %v288_v48 = vadd.f32 0.5, %v256_v31  ;;  %v258_v58 = vmul.f32 0.5, %v565_v45 }
  0x63   : > { %v569_v10 = vpop.eup %568  ;;  %349 = vst [vmem:[%s965_s17 + $0xa0] sm:$0xff] %v317_v28  ;;  %v319_v30 = vmul.f32 %v287_v32, %v888_v36  ;;  %v289_v59 = vadd.f32 0.5, %v257_v8  ;;  %v259_v49 = vmul.f32 0.5, %v567_v53 }
  0x64   : > { %v571_v33 = vpop.eup %570  ;;  %350 = vst [vmem:[%s965_s17 + $0xa8] sm:$0xff] %v318_v29  ;;  %v320_v34 = vmul.f32 %v288_v48, %v894_v40  ;;  %v290_v12 = vadd.f32 0.5, %v258_v58  ;;  %v260_v63 = vmul.f32 0.5, %v569_v10 }
  0x65   : > { %v573_v50 = vpop.eup %572  ;;  %351 = vst [vmem:[%s965_s17 + $0xb0] sm:$0xff] %v319_v30  ;;  %v321_v35 = vmul.f32 %v289_v59, %v897_v41  ;;  %v291_v37 = vadd.f32 0.5, %v259_v49  ;;  %v261_v14 = vmul.f32 0.5, %v571_v33 }
  0x66   : > { %v575_v0 = vpop.eup %574  ;;  %352 = vst [vmem:[%s965_s17 + $0xb8] sm:$0xff] %v320_v34  ;;  %v322_v36 = vmul.f32 %v290_v12, %v900_v42  ;;  %v292_v54 = vadd.f32 0.5, %v260_v63  ;;  %v262_v3 = vmul.f32 0.5, %v573_v50 }
  0x67   : > { %v577_v40 = vpop.eup %576  ;;  %353 = vst [vmem:[%s965_s17 + $0xc0] sm:$0xff] %v321_v35  ;;  %v323_v16 = vmul.f32 %v291_v37, %v908_v46  ;;  %v293_v38 = vadd.f32 0.5, %v261_v14  ;;  %v263_v55 = vmul.f32 0.5, %v575_v0  ;;  %v1104_v46 = vld [vmem:[#allocation8_spill] sm:$0xff] }
  0x68   : > { %354 = vst [vmem:[%s965_s17 + $0xc8] sm:$0xff] %v322_v36  ;;  %v324_v41 = vmul.f32 %v292_v54, %v911_v47  ;;  %v294_v1 = vadd.f32 0.5, %v262_v3  ;;  %v264_v17 = vmul.f32 0.5, %v577_v40 }
  0x69   : > { %355 = vst [vmem:[%s965_s17 + $0xd0] sm:$0xff] %v323_v16  ;;  %v325_v42 = vmul.f32 %v293_v38, %v923_v51  ;;  %v295_v9 = vadd.f32 0.5, %v263_v55 }
  0x6a   : > { %356 = vst [vmem:[%s965_s17 + $0xd8] sm:$0xff] %v324_v41  ;;  %v326_v56 = vmul.f32 %v294_v1, %v1104_v46  ;;  %v296_v39 = vadd.f32 0.5, %v264_v17 }
  0x6b   : > { %357 = vst [vmem:[%s965_s17 + $0xe0] sm:$0xff] %v325_v42  ;;  %v327_v11 = vmul.f32 %v295_v9, %v1105_v19 }
  0x6c   : > { %358 = vst [vmem:[%s965_s17 + $0xe8] sm:$0xff] %v326_v56  ;;  %v328_v47 = vmul.f32 %v296_v39, %v947_v62 }
  0x6d   : > { %359 = vst [vmem:[%s965_s17 + $0xf0] sm:$0xff] %v327_v11 }
  0x6e   : > { %360 = vst [vmem:[%s965_s17 + $0xf8] sm:$0xff] %v328_v47 }
  0x6f   : > { %621 = shalt.err (!%p618_p1)
}
  0x70   : > { %s622_s13 = scalar_lea.hbm %s1043_s2, 4096  ;;  %s626_s20 = scalar_lea.hbm %s1093_s1, 16384 }
  0x71   : > { %p623_p3 = scmp.ne.s32.totalorder %s1043_s2, %s622_s13  ;;  %p627_p0 = scmp.lt.u32.totalorder %s1043_s2, %s1093_s1 }
  0x72   : > { %p628_p2 = scmp.lt.u32.totalorder %s626_s20, %s622_s13  ;;  %p630_p6 = scmp.lt.u32.totalorder %s622_s13, %s1043_s2 }
  0x73   : > { %p624_p4 = pnand %p623_p3, %p1106_p10 }
  0x74   : > { %p629_p7 = por %p628_p2, %p627_p0 }
  0x75   : > { %p625_p5 = pneg %p624_p4 }
  0x76   : > { %p631_p11 = por %p630_p6, %p629_p7 }
  0x78   : > { %p632_p12 = pnand %p631_p11, %p625_p5 }
  0x7a   : > { %635 = shalt.err (!%p632_p12)
}
  0x7b   : > { %s680_s24 = smov 128   ;;  %s681_s26 = smov 8  }
  0x7c   : > { %466 = dma.vmem_to_hbm [thread:$0]  (%p1106_p10), %s1045_s27, 4096, %s1043_s2, %s362_s10, %s680_s24, %s680_s24, %s681_s26  }
  0x7d PF: > { %p477_p8 = scmp.ge.s32.totalorder %s674_s9, 2  ;;  %s390_s30 = sand.u32 1, %s662_s6  }
  0x7e   : > { %p1107_p9 = scmp.ne.s32.totalorder %s1100_s19, 0  ;;  %s391_s17 = scalar_lea.sflag [#allocation4], %s390_s30 }
  0x80   : > { %p473_p13 = pnand %p477_p8, %p1107_p9 }
  0x82   : > { %657 = dma.done.wait (!%p473_p13), %s391_s17, 4096  }
  0x83   : > { %659 = vsyncadd (!%p473_p13), %s391_s17, 4294963200  ;;  %p14_p1 = scmp.ge.s32.totalorder %s717_s12, 6   ;;  %s1108_s6 = smov %s666_s7 }
  0x84   : > { %s1109_s7 = smov %s670_s8  ;;  %s1110_s8 = smov %s729_s15 }
  0x85   : > { %s1111_s9 = smov %s717_s12  ;;  %16 = sbr.rel (!%p14_p1) target bundleno = 5 (0x5), region = 69 }
  0x8c   :  { %396 = vsyncpa [#allocation3], 1 }
  0x8d   :  { %398 = vsyncpa [#allocation3 + $0x1], 1 }
  0x8e   :  { %399 = vsyncpa [#allocation4], 1 }
  0x8f   :  { %401 = vsyncpa [#allocation4 + $0x1], 1 }

</bundles_post_ra>
